<compile_context>
chip_gen: v6e
topology: v6e:2x2x1
jax: 0.10.0
libtpu: 0.0.40
codegen_flags: <defaults>
</compile_context>

<pallas_src>
import jax
import jax.numpy as jnp
from jax.experimental import pallas as pl
from jax.experimental.pallas import tpu as pltpu


def _local_attention_kernel(x_ref, w1_ref, b1_ref, w2_ref, out_ref, wts_ref):
    """One grid step processes a tile of TB batch elements."""
    x3 = x_ref[...]                                     # (TB, S, H), stream dtype (f32/bf16)
    TB, S, H = x3.shape
    I = w1_ref.shape[1]

    # ---- projection: Linear(H->I) + ReLU as ONE (TB*S, H) @ (H, I) MXU matmul ----
    x2 = x3.reshape(TB * S, H)                          # leading-dim collapse: layout no-op
    h = jnp.dot(x2, w1_ref[...], preferred_element_type=jnp.float32) + b1_ref[...]
    h = jnp.maximum(h, 0.0)                             # (TB*S, I) f32

    # ---- Linear(I->1): VPU multiply + XLU lane reduce (no N=1 MXU matmul).
    # b2 is omitted on purpose: softmax(energy + c) == softmax(energy).
    # (TB*S,I)->(TB,S,I) is a free leading-dim split; the product temp is accounted for
    # in the VMEM budget that picks TB.
    prod = h.reshape(TB, S, I) * w2_ref[...]            # (TB, S, I) f32
    # Same energy in two orientations so neither the softmax (wants S on lanes) nor the
    # weighted sum over S (wants S on sublanes) needs a lane<->sublane relayout:
    energy = jnp.sum(prod, axis=-1)                     # (TB, S)    : S on lanes
    energy_c = jnp.sum(prod, axis=-1, keepdims=True)    # (TB, S, 1) : S on sublanes

    # ---- softmax over the sequence axis (lane reductions) ----
    m = jnp.max(energy, axis=-1, keepdims=True)         # (TB, 1)
    p = jnp.exp(energy - m)                             # (TB, S)
    denom = jnp.sum(p, axis=-1, keepdims=True)          # (TB, 1)
    # Returned weights use an EXACT divide so they sum to 1 at f32 precision.
    wts_ref[...] = p / denom                            # dense 2-D (TB, S) store

    # ---- attended vector: VPU multiply + sublane reduce (no M=1 MXU matmuls) ----
    m_c = jnp.max(energy_c, axis=1, keepdims=True)      # (TB, 1, 1)  (== m, other layout)
    p_c = jnp.exp(energy_c - m_c)                       # (TB, S, 1)  unnormalized weights
    xf = x3.astype(jnp.float32)                         # explicit f32 (v5e VPU has no bf16)
    attended = jnp.sum(p_c * xf, axis=1)                # (TB, H) f32, reduce over S
    # Normalize with the EUP approximate reciprocal (free slot); denominator == denom.
    attended = attended * pl.reciprocal(denom, approx=True)   # (TB,H)*(TB,1) lane bcast
    out_ref[...] = attended                             # dense 2-D (TB, H) store


def _vmem_capacity_bytes():
    """Per-TensorCore VMEM capacity; conservative fallback if the query is unavailable."""
    try:
        cap = getattr(pltpu.get_tpu_info(), "vmem_capacity_bytes", None)
        if cap:
            return int(cap)
    except Exception:
        pass
    return 64 * 1024 * 1024  # v7x per-core VMEM: safe lower bound for every generation


def _per_batch_step_bytes(S, H, I, x_bytes):
    """Approximate VMEM bytes one batch element costs per grid step (incl. double buffering)."""
    return (S * H * (2 * x_bytes + 8)     # 2x-buffered x tile + f32 upcast / (p (x) x) temps
            + S * I * 8                   # f32 h + h*w2 product
            + S * 4 * 4                   # energy / p / weights rows (f32)
            + (H + S) * 4 * 2)            # 2x-buffered (TB,H) and (TB,S) output slabs


def _largest_divisor_tile(B, cap, step):
    best = None
    tb = step
    while tb <= min(B, cap):
        if B % tb == 0:
            best = tb
        tb += step
    return best


def _pick_batch_tile(B, S, H, I, x_bytes, budget_bytes):
    per_b = _per_batch_step_bytes(S, H, I, x_bytes)
    cap = max(1, budget_bytes // per_b)
    # Keep >= 2 grid steps whenever 8-aligned tiles allow it, so 2-TC parts (v7x) can
    # shard the "parallel" batch axis across both TensorCores.  On 1-TC chips this costs
    # one extra ~0.35us grid step -> negligible.
    if B >= 16:
        tb = _largest_divisor_tile(B, min(cap, B // 2), 8)
        if tb is not None:
            return tb
    tb = _largest_divisor_tile(B, cap, 8)     # largest 8-aligned divisor that fits
    if tb is not None:
        return tb
    tb = _largest_divisor_tile(B, cap, 1)     # any divisor that fits (small batches)
    if tb is not None:
        return tb
    return B                                  # nothing smaller divides B: single step


def local_attention(encoder_outputs, w1, b1, w2, b2=None, *, stream_dtype=None):
    """encoder_outputs: (B, S, H). Returns (outputs (B, H) f32, weights (B, S) f32).

    `b2` is accepted for API parity with the PyTorch module but softmax shift-invariance
    makes it a no-op for the returned quantities, so it is not sent to the kernel.
    `stream_dtype` (e.g. jnp.bfloat16) optionally narrows the HBM-dominant x / w1 streams;
    all accumulation stays f32.
    """
    del b2
    B, S, H = encoder_outputs.shape
    I = w1.shape[1]

    x = encoder_outputs
    if stream_dtype is not None:
        x = x.astype(stream_dtype)
        w1 = w1.astype(stream_dtype)
    x_bytes = jnp.dtype(x.dtype).itemsize

    vmem_cap = _vmem_capacity_bytes()
    budget = (vmem_cap * 3) // 8          # working-set budget (headroom for compiler temps)
    vmem_limit = (vmem_cap * 3) // 4      # scoped VMEM the compiler may use

    TB = _pick_batch_tile(B, S, H, I, x_bytes, budget)
    grid = (B // TB,)

    b1_row = b1.reshape(1, I).astype(jnp.float32)
    w2_row = w2.reshape(1, I).astype(jnp.float32)

    # TODO(synk): for production shapes where H/I are not multiples of 128 (or S not a
    # multiple of 8), zero-pad w1 columns / w2 rows / the H axis and -inf-mask padded
    # sequence positions at the wrapper so every slab stays lane-dense.
    out, wts = pl.pallas_call(
        _local_attention_kernel,
        out_shape=(
            jax.ShapeDtypeStruct((B, H), jnp.float32),
            jax.ShapeDtypeStruct((B, S), jnp.float32),
        ),
        grid_spec=pltpu.PrefetchScalarGridSpec(
            num_scalar_prefetch=0,
            grid=grid,
            in_specs=[
                # Streaming x tile; if xprof shows exposed DMA at large TB, add
                # pipeline_mode=pl.Buffered(3) here and Buffered(1) on the weight specs.
                pl.BlockSpec((TB, S, H), lambda i: (i, 0, 0)),
                pl.BlockSpec((H, I), lambda i: (0, 0)),          # w1 (resident)
                pl.BlockSpec((1, I), lambda i: (0, 0)),          # b1 row
                pl.BlockSpec((1, I), lambda i: (0, 0)),          # w2 as a row vector
            ],
            out_specs=[
                pl.BlockSpec((TB, H), lambda i: (i, 0)),         # attended outputs (dense 2-D)
                pl.BlockSpec((TB, S), lambda i: (i, 0)),         # attention weights (dense 2-D)
            ],
        ),
        compiler_params=pltpu.CompilerParams(
            dimension_semantics=("parallel",),
            vmem_limit_bytes=int(vmem_limit),
        ),
    )(x, w1, b1_row, w2_row)

    return out, wts


def _reference(x, w1, b1, w2, b2):
    h = jnp.maximum(jnp.einsum("bsh,hi->bsi", x, w1) + b1, 0.0)
    energy = jnp.einsum("bsi,io->bso", h, w2) + b2          # (B, S, 1)
    weights = jax.nn.softmax(energy[..., 0], axis=1)        # (B, S)
    outputs = jnp.sum(x * weights[..., None], axis=1)       # (B, H)
    return outputs, weights


if __name__ == "__main__":
    B, S, H, I = 2, 8, 32, 16   # batch, seq, hidden_dim, inter_dim

    key = jax.random.PRNGKey(0)
    kx, k1, k2, k3, k4 = jax.random.split(key, 5)

    encoder_outputs = jax.random.normal(kx, (B, S, H), dtype=jnp.float32)

    # Deterministic synthetic parameters (PyTorch-Linear-like uniform init).
    lim1 = 1.0 / jnp.sqrt(H)
    w1 = jax.random.uniform(k1, (H, I), minval=-lim1, maxval=lim1, dtype=jnp.float32)
    b1 = jax.random.uniform(k2, (I,), minval=-lim1, maxval=lim1, dtype=jnp.float32)
    lim2 = 1.0 / jnp.sqrt(I)
    w2 = jax.random.uniform(k3, (I, 1), minval=-lim2, maxval=lim2, dtype=jnp.float32)
    b2 = jax.random.uniform(k4, (1,), minval=-lim2, maxval=lim2, dtype=jnp.float32)

    outputs, weights = local_attention(encoder_outputs, w1, b1, w2, b2)
    jax.block_until_ready((outputs, weights))

    ref_out, ref_wts = _reference(encoder_outputs, w1, b1, w2, b2)
    assert outputs.shape == (B, H) and weights.shape == (B, S)
    # attended path uses pl.reciprocal(approx=True) (~1e-3 rel); weights use an exact divide.
    assert jnp.allclose(outputs, ref_out, atol=2e-3, rtol=2e-3)
    assert jnp.allclose(weights, ref_wts, atol=1e-5, rtol=1e-5)
    assert jnp.allclose(jnp.sum(weights, axis=1), 1.0, atol=1e-5)

    # bf16 streaming path (halves HBM traffic on the dominant x stream); looser tolerance.
    out_bf16, wts_bf16 = local_attention(encoder_outputs, w1, b1, w2, b2,
                                         stream_dtype=jnp.bfloat16)
    jax.block_until_ready((out_bf16, wts_bf16))
    assert jnp.allclose(out_bf16, ref_out, atol=5e-2, rtol=5e-2)
    assert jnp.allclose(wts_bf16, ref_wts, atol=5e-2, rtol=5e-2)

    print("KERNEL_OK")
</pallas_src>

<mosaic_0001>
module attributes {stable_mosaic.version = 11 : i64} {
  func.func @_local_attention_kernel(%arg0: i32, %arg1: memref<2x8x32xf32, #tpu.memory_space<vmem>>, %arg2: memref<32x16xf32, #tpu.memory_space<vmem>>, %arg3: memref<1x16xf32, #tpu.memory_space<vmem>>, %arg4: memref<1x16xf32, #tpu.memory_space<vmem>>, %arg5: memref<2x32xf32, #tpu.memory_space<vmem>>, %arg6: memref<2x8xf32, #tpu.memory_space<vmem>>) attributes {dimension_semantics = [#tpu.dimension_semantics<parallel>], iteration_bounds = array<i64: 1>, scalar_prefetch = 0 : i64, scratch_operands = 0 : i64, tpu.core_type = #tpu.core_type<tc>, window_params = [{transform_indices = @transform_0, window_bounds = array<i64: 2, 8, 32>}, {pipeline_mode = #tpu.pipeline_mode<synchronous>, transform_indices = @transform_1, window_bounds = array<i64: 32, 16>}, {pipeline_mode = #tpu.pipeline_mode<synchronous>, transform_indices = @transform_2, window_bounds = array<i64: 1, 16>}, {pipeline_mode = #tpu.pipeline_mode<synchronous>, transform_indices = @transform_3, window_bounds = array<i64: 1, 16>}, {transform_indices = @transform_4, window_bounds = array<i64: 2, 32>}, {transform_indices = @transform_5, window_bounds = array<i64: 2, 8>}]} {
    %c0 = arith.constant 0 : index
    %c0_0 = arith.constant 0 : index
    %c0_1 = arith.constant 0 : index
    %0 = vector.load %arg1[%c0, %c0_0, %c0_1] : memref<2x8x32xf32, #tpu.memory_space<vmem>>, vector<2x8x32xf32>
    %1 = vector.shape_cast %0 : vector<2x8x32xf32> to vector<16x32xf32>
    %c0_2 = arith.constant 0 : index
    %c0_3 = arith.constant 0 : index
    %2 = vector.load %arg2[%c0_2, %c0_3] : memref<32x16xf32, #tpu.memory_space<vmem>>, vector<32x16xf32>
    %cst = arith.constant dense<0.000000e+00> : vector<16x16xf32>
    %3 = tpu.matmul %1, %2, %cst {dimension_numbers = #tpu.dot_dimension_numbers<[1], [0], [0], [1], [0, 0, 1, 1], [], []>} : vector<16x32xf32>, vector<32x16xf32>, vector<16x16xf32> -> vector<16x16xf32>
    %c0_4 = arith.constant 0 : index
    %c0_5 = arith.constant 0 : index
    %4 = vector.load %arg3[%c0_4, %c0_5] : memref<1x16xf32, #tpu.memory_space<vmem>>, vector<1x16xf32>
    %5 = vector.broadcast %4 : vector<1x16xf32> to vector<16x16xf32>
    %6 = arith.addf %3, %5 : vector<16x16xf32>
    %cst_6 = arith.constant 0.000000e+00 : f32
    %7 = vector.broadcast %cst_6 : f32 to vector<16x16xf32>
    %8 = arith.maximumf %6, %7 : vector<16x16xf32>
    %9 = vector.shape_cast %8 : vector<16x16xf32> to vector<2x8x16xf32>
    %c0_7 = arith.constant 0 : index
    %c0_8 = arith.constant 0 : index
    %10 = vector.load %arg4[%c0_7, %c0_8] : memref<1x16xf32, #tpu.memory_space<vmem>>, vector<1x16xf32>
    %11 = vector.shape_cast %10 : vector<1x16xf32> to vector<1x1x16xf32>
    %12 = vector.broadcast %11 : vector<1x1x16xf32> to vector<2x8x16xf32>
    %13 = arith.mulf %9, %12 : vector<2x8x16xf32>
    %cst_9 = arith.constant dense<0.000000e+00> : vector<2x8xf32>
    %14 = vector.multi_reduction <add>, %13, %cst_9 [2] : vector<2x8x16xf32> to vector<2x8xf32>
    %cst_10 = arith.constant dense<0.000000e+00> : vector<2x8xf32>
    %15 = vector.multi_reduction <add>, %13, %cst_10 [2] : vector<2x8x16xf32> to vector<2x8xf32>
    %16 = vector.shape_cast %15 : vector<2x8xf32> to vector<2x8x1xf32>
    %cst_11 = arith.constant dense<0xFF800000> : vector<2xf32>
    %17 = vector.multi_reduction <maximumf>, %14, %cst_11 [1] : vector<2x8xf32> to vector<2xf32>
    %18 = vector.shape_cast %17 : vector<2xf32> to vector<2x1xf32>
    %19 = vector.broadcast %18 : vector<2x1xf32> to vector<2x8xf32>
    %20 = arith.subf %14, %19 : vector<2x8xf32>
    %21 = math.exp %20 : vector<2x8xf32>
    %cst_12 = arith.constant dense<0.000000e+00> : vector<2xf32>
    %22 = vector.multi_reduction <add>, %21, %cst_12 [1] : vector<2x8xf32> to vector<2xf32>
    %23 = vector.shape_cast %22 : vector<2xf32> to vector<2x1xf32>
    %24 = vector.broadcast %23 : vector<2x1xf32> to vector<2x8xf32>
    %25 = arith.divf %21, %24 : vector<2x8xf32>
    %c0_13 = arith.constant 0 : index
    %c0_14 = arith.constant 0 : index
    %26 = vector.load %arg6[%c0_13, %c0_14] : memref<2x8xf32, #tpu.memory_space<vmem>>, vector<2x8xf32>
    tpu.vector_store %arg6[%c0_13, %c0_14], %25 {strides = array<i32>} : memref<2x8xf32, #tpu.memory_space<vmem>>, vector<2x8xf32>,
    %cst_15 = arith.constant dense<0xFF800000> : vector<2x1xf32>
    %27 = vector.multi_reduction <maximumf>, %16, %cst_15 [1] : vector<2x8x1xf32> to vector<2x1xf32>
    %28 = vector.shape_cast %27 : vector<2x1xf32> to vector<2x1x1xf32>
    %29 = vector.broadcast %28 : vector<2x1x1xf32> to vector<2x8x1xf32>
    %30 = arith.subf %16, %29 : vector<2x8x1xf32>
    %31 = math.exp %30 : vector<2x8x1xf32>
    %32 = vector.broadcast %31 : vector<2x8x1xf32> to vector<2x8x32xf32>
    %33 = arith.mulf %32, %0 : vector<2x8x32xf32>
    %cst_16 = arith.constant dense<0.000000e+00> : vector<2x32xf32>
    %34 = vector.multi_reduction <add>, %33, %cst_16 [1] : vector<2x8x32xf32> to vector<2x32xf32>
    %35 = tpu.reciprocal %23 {approx = true} : vector<2x1xf32> -> vector<2x1xf32>
    %36 = vector.broadcast %35 : vector<2x1xf32> to vector<2x32xf32>
    %37 = arith.mulf %34, %36 : vector<2x32xf32>
    %c0_17 = arith.constant 0 : index
    %c0_18 = arith.constant 0 : index
    %38 = vector.load %arg5[%c0_17, %c0_18] : memref<2x32xf32, #tpu.memory_space<vmem>>, vector<2x32xf32>
    tpu.vector_store %arg5[%c0_17, %c0_18], %37 {strides = array<i32>} : memref<2x32xf32, #tpu.memory_space<vmem>>, vector<2x32xf32>,
    return
  }
  func.func @transform_0(%arg0: i32) -> (i32, i32, i32) {
    %c0_i32 = arith.constant 0 : i32
    %c0_i32_0 = arith.constant 0 : i32
    %c0_i32_1 = arith.constant 0 : i32
    return %arg0, %c0_i32, %c0_i32_0 : i32, i32, i32
  }
  func.func @transform_1(%arg0: i32) -> (i32, i32) {
    %c0_i32 = arith.constant 0 : i32
    %c0_i32_0 = arith.constant 0 : i32
    %c0_i32_1 = arith.constant 0 : i32
    return %c0_i32, %c0_i32_0 : i32, i32
  }
  func.func @transform_2(%arg0: i32) -> (i32, i32) {
    %c0_i32 = arith.constant 0 : i32
    %c0_i32_0 = arith.constant 0 : i32
    %c0_i32_1 = arith.constant 0 : i32
    return %c0_i32, %c0_i32_0 : i32, i32
  }
  func.func @transform_3(%arg0: i32) -> (i32, i32) {
    %c0_i32 = arith.constant 0 : i32
    %c0_i32_0 = arith.constant 0 : i32
    %c0_i32_1 = arith.constant 0 : i32
    return %c0_i32, %c0_i32_0 : i32, i32
  }
  func.func @transform_4(%arg0: i32) -> (i32, i32) {
    %c0_i32 = arith.constant 0 : i32
    %c0_i32_0 = arith.constant 0 : i32
    return %arg0, %c0_i32 : i32, i32
  }
  func.func @transform_5(%arg0: i32) -> (i32, i32) {
    %c0_i32 = arith.constant 0 : i32
    %c0_i32_0 = arith.constant 0 : i32
    return %arg0, %c0_i32 : i32, i32
  }
}

</mosaic_0001>

<bundles_post_ra>
// kernel: tpu_custom_call.1
= control target key start
LH: loop header
LB: loop body
LE: loop exit
PB: predicated region body
PF: predicated region fallthrough
CT: control target
= control target key end

     0   :  { %11 = vsyncpa [#allocation3], 0  ;;  %vm34_vm0 = vcmask 261120   ;;  %s484_s0 = inlined_call_operand.vmem [shape: f32[2,8,32], index: 0, kind: input, shape index: {}]   ;;  %s485_s1 = inlined_call_operand.vmem [shape: f32[32,16], index: 1, kind: input, shape index: {}]   ;;  %s486_s2 = inlined_call_operand.vmem [shape: f32[1,16], index: 2, kind: input, shape index: {}]   ;;  %s487_s3 = inlined_call_operand.vmem [shape: f32[1,16], index: 3, kind: input, shape index: {}]   ;;  %s488_s4 = inlined_call_operand.hbm [shape: f32[2,32], index: 4, kind: output, shape index: {0}]   ;;  %s489_s5 = inlined_call_operand.hbm [shape: f32[2,8], index: 5, kind: output, shape index: {1}]  }
   0x1   :  { %v26_v0 = vld [vmem:[%s485_s1 + $0x18] sm:$0xff]  ;;  %v25_v1 = vld [vmem:[%s485_s1 + $0x10] sm:$0xff]  ;;  %v427_v2 = vld [vmem:[%s484_s0] sm:$0xff] }
   0x2   :  { %311 = vmatprep.subr.mxu0 %v26_v0  ;;  %v24_v3 = vld [vmem:[%s485_s1 + $0x8] sm:$0xff]  ;;  %319 = vmatprep.mubr.msk.f32.mxu0 %vm34_vm0, %v427_v2 }
   0x3   :  { %312 = vmatpush3.msra.mxu0 %v26_v0 }
   0x4   :  { %12 = vsyncpa [#allocation5], 0  ;;  %313 = vmatprep.subr.mxu0 %v25_v1  ;;  %v23_v4 = vld [vmem:[%s485_s1] sm:$0xff]  ;;  %v440_v5 = vld [vmem:[%s484_s0 + $0x8] sm:$0xff]  ;;  %vm127_vm1 = vcmask 130048   ;;  %v136_v18 = vlaneseq  ;;  %vm146_vm2 = vcmask 1041409  }
   0x5   :  { %314 = vmatpush3.msra.mxu0 %v25_v1  ;;  %v301_v6 = vld [vmem:[%s486_s2] ss:$0 sm:$0xff]  ;;  %vm149_vm3 = vcmask 58368   ;;  %v385_v28 = vmov 0   ;;  %vm271_vm4 = vcmask 254976   ;;  %s386_s0 = smov [#allocation2]  }
   0x6   :  { %315 = vmatprep.subr.mxu0 %v24_v3  ;;  %v304_v13 = vld [vmem:[%s487_s3] ss:$0 sm:$0xff]  ;;  %v137_v19 = vand.u32 127, %v136_v18  ;;  %v450_v20 = vshrl.u32 %v136_v18, 7  ;;  %326 = vset.pattern.permute.xlu0 %v385_v28  ;;  %s279_s2 = sshll.u32 %s386_s0, 4  ;;  %s280_s2 = int_to_ptr.vmem [resolvable:$true] %s279_s2 }
   0x7   :  { %316 = vmatpush3.msra.mxu0 %v24_v3  ;;  %325 = vset.pattern.permute.xlu1 %v385_v28  ;;  %s341_s3 = scalar_lea.vmem %s280_s2, 32  ;;  %p346_p1 = scmp.lt.s32.totalorder %s280_s2, %s280_s2 }
   0x8   :  { %317 = vmatprep.subr.mxu0 %v23_v4  ;;  %v453_v22 = vsub.s32 %v137_v19, %v450_v20  ;;  %v156_v29 = vsub.s32 0, %v450_v20  ;;  %v160_v30 = vsub.s32 1, %v450_v20  ;;  %p342_p0 = scmp.ne.s32.totalorder %s280_s2, %s341_s3  ;;  %p347_p2 = scmp.lt.s32.totalorder %s341_s3, %s341_s3 }
   0x9   :  { %318 = vmatpush3.msra.mxu0 %v23_v4 }
   0xa   :  { %320 = vmatmul.mubr.msk.f32.vlgmr.msra.gmra.mxu0 %vm34_vm0, %v440_v5  ;;  %p348_p3 = por %p347_p2, %p346_p1 }
   0xc   :  { %p349_p4 = pnand %p348_p3, %p342_p0 }
  0xca   :  { %v321_v7 = vpop.f32.mrf.mxu0 }
  0xcb   :  { %v113_v8 = vadd.f32 %v321_v7, %v301_v6 }
  0xcc   :  { %v107_v9 = vpop.f32.mrf.mxu0 }
  0xcd   :  { %v108_v10 = vadd.f32 %v301_v6, %v107_v9  ;;  %v117_v11 = vmax.f32 %v113_v8, 0.0 }
  0xcf   :  { %v116_v12 = vmax.f32 %v108_v10, 0.0  ;;  %v126_v16 = vmul.f32 %v304_v13, %v117_v11 }
  0xd1   :  { %v125_v14 = vmul.f32 %v304_v13, %v116_v12  ;;  %v131_v17 = vsel %vm127_vm1, %v126_v16, 0.0 }
  0xd3   :  { %v128_v15 = vsel %vm127_vm1, %v125_v14, 0.0 }
  0xd4   :  { %129 = vadd.xlane.f32.xlu0 %v128_v15 }
  0xd8   :  { %132 = vadd.xlane.f32.xlu0 %v131_v17 }
 0x15d   :  { %v130_v21 = vpop.xlane.xlu0 %129 }
 0x15e   :  { %v141_v24 = vrot.slane %v130_v21, %v453_v22  ;;  %v225_v47 = vrot.slane %v130_v21, 4 }
 0x160   :  { %v226_v49 = vmax.f32 %v130_v21, %v225_v47 }
 0x161   :  { %v133_v23 = vpop.xlane.xlu0 %132 }
 0x162   :  { %v145_v25 = vrot.slane %v133_v23, %v453_v22  ;;  %v231_v46 = vrot.slane %v133_v23, 4  ;;  %v227_v51 = vrot.slane %v226_v49, 2 }
 0x164   :  { %v147_v26 = vsel %vm146_vm2, %v145_v25, %v141_v24  ;;  %v232_v48 = vmax.f32 %v133_v23, %v231_v46  ;;  %v228_v53 = vmax.f32 %v226_v49, %v227_v51 }
 0x165   :  { %v150_v27 = vsel %vm149_vm3, %v147_v26, -inf }
 0x166   :  { %151 = vmax.xlane.f32.xlu1 %v150_v27  ;;  %v233_v50 = vrot.slane %v232_v48, 2  ;;  %v229_v55 = vrot.slane %v228_v53, 1 }
 0x168   :  { %v234_v52 = vmax.f32 %v232_v48, %v233_v50  ;;  %v230_v57 = vmax.f32 %v228_v53, %v229_v55 }
 0x16a   :  { %v235_v54 = vrot.slane %v234_v52, 1  ;;  %v237_v59 = vsub.f32 %v130_v21, %v230_v57 }
 0x16c   :  { %v236_v56 = vmax.f32 %v234_v52, %v235_v54  ;;  %v239_v61 = vmul.f32 1.442695, %v237_v59 }
 0x16e   :  { %v238_v58 = vsub.f32 %v133_v23, %v236_v56 }
 0x170   :  { %v241_v60 = vmul.f32 1.442695, %v238_v58 }
 0x1ef   :  { %v152_v31 = vpop.xlane.xlu1 %151 }
 0x1f0   :  { %v157_v32 = vrot.slane %v152_v31, %v156_v29  ;;  %v161_v33 = vrot.slane %v152_v31, %v160_v30 }
 0x1f2   :  { %v164_v34 = vsub.f32 %v130_v21, %v157_v32  ;;  %v165_v35 = vsub.f32 %v133_v23, %v161_v33 }
 0x1f4   :  { %v166_v36 = vmul.f32 1.442695, %v164_v34  ;;  %v168_v37 = vmul.f32 1.442695, %v165_v35 }
 0x1f6   :  { %327 = vpow2.f32 %v166_v36 }
 0x1f7   :  { %329 = vpow2.f32 %v168_v37 }
 0x1f8   :  { %331 = vpow2.f32 %v241_v60 }
 0x1f9   :  { %333 = vpow2.f32 %v239_v61 }
 0x203   :  { %v328_v38 = vpop.eup %327 }
 0x204   :  { %v461_v39 = vpop.eup %329  ;;  %173 = vperm.xlu1 %325, %v328_v38  }
 0x205   :  { %176 = vperm.xlu0 %326, %v461_v39   ;;  %v332_v62 = vpop.eup %331 }
 0x206   :  { %v334_v63 = vpop.eup %333  ;;  %v244_v0 = vmul.f32 %v332_v62, %v440_v5 }
 0x207   :  { %v243_v1 = vmul.f32 %v334_v63, %v427_v2 }
 0x208   :  { %v252_v3 = vsel %vm34_vm0, %v244_v0, 0.0 }
 0x209   :  { %v245_v4 = vsel %vm34_vm0, %v243_v1, 0.0  ;;  %v253_v6 = vrot.slane %v252_v3, 4 }
 0x20a   :  { %v246_v7 = vrot.slane %v245_v4, 4 }
 0x20b   :  { %v254_v8 = vadd.f32 %v253_v6, %v252_v3 }
 0x20c   :  { %v247_v12 = vadd.f32 %v246_v7, %v245_v4 }
 0x20d   :  { %v255_v13 = vrot.slane %v254_v8, 2 }
 0x20e   :  { %v248_v14 = vrot.slane %v247_v12, 2 }
 0x20f   :  { %v256_v15 = vadd.f32 %v255_v13, %v254_v8 }
 0x210   :  { %v249_v5 = vadd.f32 %v248_v14, %v247_v12 }
 0x211   :  { %v257_v16 = vrot.slane %v256_v15, 1 }
 0x212   :  { %v250_v2 = vrot.slane %v249_v5, 1 }
 0x213   :  { %v258_v18 = vadd.f32 %v257_v16, %v256_v15 }
 0x214   :  { %v251_v23 = vadd.f32 %v250_v2, %v249_v5 }
 0x27f   :  { %v174_v40 = vpop.permute.xlu1 %173 }
 0x280   :  { %v177_v41 = vpop.permute.xlu0 %176  ;;  %v181_v42 = vrot.slane %v174_v40, %v453_v22 }
 0x281   :  { %v185_v43 = vrot.slane %v177_v41, %v453_v22 }
 0x283   :  { %v186_v44 = vsel %vm146_vm2, %v185_v43, %v181_v42 }
 0x284   :  { %v188_v45 = vsel %vm149_vm3, %v186_v44, 0.0 }
 0x285   :  { %189 = vadd.xlane.f32.xlu1 %v188_v45 }
 0x30e   :  { %v190_v9 = vpop.xlane.xlu1 %189 }
 0x30f   :  { %v195_v10 = vrot.slane %v190_v9, %v156_v29  ;;  %v199_v11 = vrot.slane %v190_v9, %v160_v30  ;;  %335 = vrcp.f32 %v190_v9 }
 0x311   :  { %337 = vrcp.f32 %v195_v10 }
 0x312   :  { %339 = vrcp.f32 %v199_v11 }
 0x31c   :  { %v336_v17 = vpop.eup %335 }
 0x31d   :  { %v261_v19 = vrot.slane %v336_v17, 1  ;;  %v264_v26 = vmul.f32 %v336_v17, %v251_v23 }
 0x31e   :  { %v338_v20 = vpop.eup %337 }
 0x31f   :  { %v203_v21 = vmul.f32 %v338_v20, %v328_v38  ;;  %v265_v24 = vmul.f32 %v261_v19, %v258_v18  ;;  %v340_v25 = vpop.eup %339 }
 0x320   :  { %v205_v28 = vmul.f32 %v340_v25, %v461_v39 }
 0x321   :  { %209 = vperm.xlu0 %326, %v203_v21   ;;  %v268_v27 = vrot.slane %v265_v24, 7 }
 0x323   :  { %v269_v29 = vsel %vm146_vm2, %v268_v27, %v264_v26 }
 0x324   :  { %272 = vst.msk [vmem:[#allocation2] sm:$0x3] %vm271_vm4, %v269_v29 }
 0x325   :  { %212 = vperm.xlu0 %326, %v205_v28  }
 0x326   :  { %352 = shalt.err (!%p349_p4)
}
 0x327   :  { %282 = dma.vmem_to_hbm [thread:$0]  %s280_s2, 32, %s488_s4, [#allocation3]  }
 0x328   :  { %s387_s10 = smov [#allocation4]  }
 0x329   :  { %s289_s11 = sshll.u32 %s387_s10, 4  ;;  %s290_s11 = int_to_ptr.vmem [resolvable:$true] %s289_s11 }
 0x32a   :  { %s361_s12 = scalar_lea.vmem %s290_s11, 32  ;;  %p366_p6 = scmp.lt.s32.totalorder %s290_s11, %s290_s11 }
 0x32b   :  { %p362_p5 = scmp.ne.s32.totalorder %s290_s11, %s361_s12  ;;  %p367_p7 = scmp.lt.s32.totalorder %s361_s12, %s361_s12 }
 0x32d   :  { %p368_p8 = por %p367_p7, %p366_p6 }
 0x32f   :  { %p369_p9 = pnand %p368_p8, %p362_p5 }
 0x39c   :  { %v210_v30 = vpop.permute.xlu0 %209 }
 0x39d   :  { %v217_v32 = vrot.slane %v210_v30, %v453_v22 }
 0x3a0   :  { %v213_v31 = vpop.permute.xlu0 %212 }
 0x3a1   :  { %v221_v33 = vrot.slane %v213_v31, %v453_v22 }
 0x3a3   :  { %v222_v34 = vsel %vm146_vm2, %v221_v33, %v217_v32 }
 0x3a4   :  { %224 = vst.msk [vmem:[#allocation4] sm:$0x3] %vm149_vm3, %v222_v34 }
 0x3a5   :  { %372 = shalt.err (!%p369_p9)
}
 0x3a6   :  { %292 = dma.vmem_to_hbm [thread:$0]  %s290_s11, 32, %s489_s5, [#allocation5]  }
 0x3a7   :  { %381 = dma.done.wait [#allocation3], 32  }
 0x3a8   :  { %382 = vsyncadd [#allocation3], 4294967264 }
 0x3a9   :  { %383 = dma.done.wait [#allocation5], 32  }
 0x3aa   :  { %384 = vsyncadd [#allocation5], 4294967264 }
 0x3ab   :  { %299 = vsyncpa [#allocation3], 1 }
 0x3ac   :  { %300 = vsyncpa [#allocation5], 1 }

</bundles_post_ra>
